<compile_context>
chip_gen: v5e
topology: v5e:2x2
jax: 0.10.0
libtpu: 0.0.40
codegen_flags: <defaults>
</compile_context>

<pallas_src>
import jax
import jax.numpy as jnp
from jax.experimental import pallas as pl
from jax.experimental.pallas import tpu as pltpu

LANES = 128  # vreg lane width


def rational_kernel(c_ref, x_ref, o_ref):
    # c_ref: SMEM (8,) f32 = [a0, a1, a2, a3, b0, b1, b2, pad]
    # x_ref/o_ref: VMEM (tile_rows, 128) blocks. Compute in f32, cast on store.
    x = x_ref[...].astype(jnp.float32)
    a0, a1, a2, a3 = c_ref[0], c_ref[1], c_ref[2], c_ref[3]
    b0, b1, b2 = c_ref[4], c_ref[5], c_ref[6]
    # Horner evaluation, exactly matching the PyTorch forward:
    # N(x) = a0 + x*(a1 + x*(a2 + a3*x)),  D(x) = b0 + x*(b1 + b2*x)
    # (no abs / +1 guard on D: the PyTorch module has none either)
    n_x = a0 + x * (a1 + x * (a2 + a3 * x))
    d_x = b0 + x * (b1 + b2 * x)
    # EUP approx reciprocal (separate VLIW slot) + one Newton-Raphson refinement:
    # relative error ~2^-24, well inside rtol/atol = 1e-5, and the multi-op VALU
    # divide sequence disappears.  Note: masked lanes of a ragged last block may
    # compute garbage/Inf here; the masked store discards them (harmless on HW).
    r = pl.reciprocal(d_x, approx=True)
    r = r * (2.0 - d_x * r)
    o_ref[...] = (n_x * r).astype(o_ref.dtype)


def _round_up(v, m):
    return ((v + m - 1) // m) * m


def _choose_tile_rows(rows, itemsize, target_block_bytes):
    """Pick the row-tile size.

    Big blocks (~8 MiB) amortize the ~0.35 us per-grid-step overhead; but we also
    guarantee >= 4 grid steps when rows allow (2 v7x TensorCores x 2 pipeline
    buffers each) so neither core degenerates to a single un-pipelined step, and
    we prefer an even step count so the 'parallel' split doesn't idle one core.
    """
    # Minimum sublane granularity per dtype: (8,128) f32, (16,128) bf16, (32,128) int8.
    sub = 8 * max(1, 4 // itemsize)
    if rows <= sub:
        return rows  # single block == full array (allowed even if not sub-aligned)
    bytes_per_row = LANES * itemsize
    by_bytes = max(sub, (target_block_bytes // bytes_per_row) // sub * sub)
    quarter = _round_up(pl.cdiv(rows, 4), sub)  # keep at least 4 grid steps
    tile = min(by_bytes, quarter)
    # Best-effort: nudge to an even number of steps (v7x has 2 TensorCores).
    steps = pl.cdiv(rows, tile)
    if steps % 2 == 1 and steps > 1:
        tile2 = _round_up(pl.cdiv(rows, steps + 1), sub)
        if tile2 >= sub and pl.cdiv(rows, tile2) % 2 == 0:
            tile = tile2
    return tile


def _rational_jnp(x, a, b):
    """Plain-JAX reference / tail path (exact divide)."""
    xf = x.astype(jnp.float32)
    af = a.astype(jnp.float32)
    bf = b.astype(jnp.float32)
    n_x = af[0] + xf * (af[1] + xf * (af[2] + af[3] * xf))
    d_x = bf[0] + xf * (bf[1] + bf[2] * xf)
    return (n_x / d_x).astype(x.dtype)


def rational_forward(x, a, b, *, target_block_bytes=8 * 1024 * 1024):
    """Apply the Rational activation elementwise to x (any shape, f32/bf16)."""
    orig_shape = x.shape
    orig_dtype = x.dtype
    total = x.size
    itemsize = jnp.dtype(orig_dtype).itemsize

    bulk = (total // LANES) * LANES
    if bulk == 0:
        # Smaller than one vreg row: a kernel launch would be pure overhead.
        return _rational_jnp(x, a, b)

    # Single merged SMEM coefficient vector: [a0..a3, b0..b2, 0].
    coeffs = jnp.concatenate([
        a.astype(jnp.float32).reshape(4),
        b.astype(jnp.float32).reshape(3),
        jnp.zeros((1,), jnp.float32),
    ])

    x_flat = jnp.ravel(x)
    rows = bulk // LANES
    x2d = x_flat[:bulk].reshape(rows, LANES)  # zero-copy when total % 128 == 0

    tile_rows = _choose_tile_rows(rows, itemsize, target_block_bytes)
    grid = (pl.cdiv(rows, tile_rows),)  # ragged last row-block is masked by Pallas

    out2d = pl.pallas_call(
        rational_kernel,
        out_shape=jax.ShapeDtypeStruct((rows, LANES), orig_dtype),
        grid_spec=pltpu.PrefetchScalarGridSpec(
            num_scalar_prefetch=0,
            grid=grid,
            in_specs=[
                pl.BlockSpec(memory_space=pltpu.SMEM),          # merged coeffs (8,)
                pl.BlockSpec((tile_rows, LANES), lambda i: (i, 0)),
            ],
            out_specs=pl.BlockSpec((tile_rows, LANES), lambda i: (i, 0)),
        ),
        compiler_params=pltpu.CompilerParams(
            dimension_semantics=("parallel",),
            # 8 MiB f32 blocks * 2 double-buffers * (in + out) = 32 MiB + headroom.
            # 48 MiB stays under v7x's 64 MiB physical VMEM and overrides v5e's
            # 16 MiB scoped default so double-buffering never silently shrinks.
            vmem_limit_bytes=48 * 1024 * 1024,
        ),
    )(coeffs, x2d)

    out_flat = out2d.reshape(bulk)
    if bulk != total:
        # <=127-element tail computed with plain jnp: avoids a full-tensor
        # jnp.pad + post-slice (each of which would add a full HBM round-trip).
        tail_out = _rational_jnp(x_flat[bulk:], a, b)
        out_flat = jnp.concatenate([out_flat, tail_out])
    return out_flat.reshape(orig_shape)


if __name__ == "__main__":
    # Deterministic parameter initialization (same values as the module __init__).
    a = jnp.array([1.1915, 1.5957, 0.5, 0.0218], dtype=jnp.float32)
    b = jnp.array([2.383, 0.0, 1.0], dtype=jnp.float32)

    key = jax.random.PRNGKey(0)
    x = jax.random.normal(key, (2, 4, 16, 16), dtype=jnp.float32)  # NCHW

    out = jax.block_until_ready(rational_forward(x, a, b))

    ref = _rational_jnp(x, a, b)
    assert out.shape == x.shape and out.dtype == x.dtype
    assert jnp.allclose(out, ref, rtol=1e-5, atol=1e-5)
    print("KERNEL_OK")
</pallas_src>

<mosaic_0001>
module attributes {stable_mosaic.version = 11 : i64} {
  func.func @rational_kernel(%arg0: i32, %arg1: memref<8xf32, #tpu.memory_space<smem>>, %arg2: memref<8x128xf32, #tpu.memory_space<vmem>>, %arg3: memref<8x128xf32, #tpu.memory_space<vmem>>) attributes {dimension_semantics = [#tpu.dimension_semantics<parallel>], iteration_bounds = array<i64: 2>, scalar_prefetch = 0 : i64, scratch_operands = 0 : i64, tpu.core_type = #tpu.core_type<tc>, window_params = [{transform_indices = @transform_0, window_bounds = array<i64: 8>}, {transform_indices = @transform_1, window_bounds = array<i64: 8, 128>}, {transform_indices = @transform_2, window_bounds = array<i64: 8, 128>}]} {
    %c0 = arith.constant 0 : index
    %c0_0 = arith.constant 0 : index
    %0 = vector.load %arg2[%c0, %c0_0] : memref<8x128xf32, #tpu.memory_space<vmem>>, vector<8x128xf32>
    %c0_1 = arith.constant 0 : index
    %1 = memref.load %arg1[%c0_1] : memref<8xf32, #tpu.memory_space<smem>>
    %c1 = arith.constant 1 : index
    %2 = memref.load %arg1[%c1] : memref<8xf32, #tpu.memory_space<smem>>
    %c2 = arith.constant 2 : index
    %3 = memref.load %arg1[%c2] : memref<8xf32, #tpu.memory_space<smem>>
    %c3 = arith.constant 3 : index
    %4 = memref.load %arg1[%c3] : memref<8xf32, #tpu.memory_space<smem>>
    %c4 = arith.constant 4 : index
    %5 = memref.load %arg1[%c4] : memref<8xf32, #tpu.memory_space<smem>>
    %c5 = arith.constant 5 : index
    %6 = memref.load %arg1[%c5] : memref<8xf32, #tpu.memory_space<smem>>
    %c6 = arith.constant 6 : index
    %7 = memref.load %arg1[%c6] : memref<8xf32, #tpu.memory_space<smem>>
    %8 = vector.broadcast %4 : f32 to vector<8x128xf32>
    %9 = arith.mulf %8, %0 : vector<8x128xf32>
    %10 = vector.broadcast %3 : f32 to vector<8x128xf32>
    %11 = arith.addf %10, %9 : vector<8x128xf32>
    %12 = arith.mulf %0, %11 : vector<8x128xf32>
    %13 = vector.broadcast %2 : f32 to vector<8x128xf32>
    %14 = arith.addf %13, %12 : vector<8x128xf32>
    %15 = arith.mulf %0, %14 : vector<8x128xf32>
    %16 = vector.broadcast %1 : f32 to vector<8x128xf32>
    %17 = arith.addf %16, %15 : vector<8x128xf32>
    %18 = vector.broadcast %7 : f32 to vector<8x128xf32>
    %19 = arith.mulf %18, %0 : vector<8x128xf32>
    %20 = vector.broadcast %6 : f32 to vector<8x128xf32>
    %21 = arith.addf %20, %19 : vector<8x128xf32>
    %22 = arith.mulf %0, %21 : vector<8x128xf32>
    %23 = vector.broadcast %5 : f32 to vector<8x128xf32>
    %24 = arith.addf %23, %22 : vector<8x128xf32>
    %25 = tpu.reciprocal %24 {approx = true} : vector<8x128xf32> -> vector<8x128xf32>
    %26 = arith.mulf %24, %25 : vector<8x128xf32>
    %cst = arith.constant 2.000000e+00 : f32
    %27 = vector.broadcast %cst : f32 to vector<8x128xf32>
    %28 = arith.subf %27, %26 : vector<8x128xf32>
    %29 = arith.mulf %25, %28 : vector<8x128xf32>
    %30 = arith.mulf %17, %29 : vector<8x128xf32>
    %c0_2 = arith.constant 0 : index
    %c0_3 = arith.constant 0 : index
    %31 = vector.load %arg3[%c0_2, %c0_3] : memref<8x128xf32, #tpu.memory_space<vmem>>, vector<8x128xf32>
    tpu.vector_store %arg3[%c0_2, %c0_3], %30 {strides = array<i32>} : memref<8x128xf32, #tpu.memory_space<vmem>>, vector<8x128xf32>,
    return
  }
  func.func @transform_0(%arg0: i32) -> i32 {
    %c0_i32 = arith.constant 0 : i32
    %c0_i32_0 = arith.constant 0 : i32
    return %c0_i32 : i32
  }
  func.func @transform_1(%arg0: i32) -> (i32, i32) {
    %c0_i32 = arith.constant 0 : i32
    %c0_i32_0 = arith.constant 0 : i32
    return %arg0, %c0_i32 : i32, i32
  }
  func.func @transform_2(%arg0: i32) -> (i32, i32) {
    %c0_i32 = arith.constant 0 : i32
    %c0_i32_0 = arith.constant 0 : i32
    return %arg0, %c0_i32 : i32, i32
  }
}

</mosaic_0001>

<bundles_post_ra>
// kernel: tpu_custom_call.1
= control target key start
LH: loop header
LB: loop body
LE: loop exit
PB: predicated region body
PF: predicated region fallthrough
CT: control target
= control target key end

     0   :  { %7 = vsyncpa [#allocation5], 0  ;;  %s658_s0 = inlined_call_operand.hbm [shape: f32[8], index: 0, kind: input, shape index: {}]   ;;  %s659_s1 = inlined_call_operand.hbm [shape: f32[16,128], index: 1, kind: input, shape index: {}]   ;;  %s660_s2 = inlined_call_operand.hbm [shape: f32[16,128], index: 2, kind: output, shape index: {}]  }
   0x1   :  { %8 = vsyncpa [#allocation3], 0 }
   0x2   :  { %10 = vsyncpa [#allocation3 + $0x1], 0 }
   0x3   :  { %11 = vsyncpa [#allocation4], 0 }
   0x4   :  { %13 = vsyncpa [#allocation4 + $0x1], 0  ;;  %s516_s9 = smov 0   ;;  %s518_s10 = smov 0  }
   0x5   :  { %s520_s11 = smov 0   ;;  %s522_s12 = smov 0  }
   0x6 LB: > { %s537_s13 = sadd.s32 4294967295, %s498_s12   ;;  %s304_s14 = sadd.s32 4294967294, %s498_s12   ;;  %s498_s12 = sphi %s522_s12, %s670_s12   ;;  %s494_s11 = sphi %s520_s11, %s669_s11   ;;  %s490_s10 = sphi %s518_s10, %s668_s10   ;;  %s486_s9 = sphi %s516_s9, %s667_s9  }
   0x7   : > { %p60_p0 = scmp.ne.s32.totalorder %s490_s10, %s486_s9  ;;  %p61_p1 = scmp.eq.s32.totalorder %s537_s13, 0 }
   0x8   : > { %p84_p2 = scmp.eq.s32.totalorder %s537_s13, 1  ;;  %p90_p3 = scmp.eq.s32.totalorder %s304_s14, 1 }
   0x9   : > { %p546_p4 = por %p61_p1, %p60_p0  ;;  %p305_p5 = scmp.ge.s32.totalorder %s498_s12, 1 }
   0xa   : > { %p551_p6 = por %p90_p3, %p60_p0  ;;  %p97_p7 = scmp.lt.s32.totalorder %s498_s12, 3 }
   0xb   : > { %s109_s19 = sshll.u32 %s658_s0, 4  ;;  %s567_s21 = sadd.s32 1, %s498_s12   ;;  %s110_s19 = int_to_ptr.hbm [resolvable:$true] %s109_s19 }
   0xc   : > { %p559_p8 = pnand %p305_p5, %p97_p7  ;;  %s44_s22 = ssub.s32 %s498_s12, %s567_s21 }
   0xd   : > { %p45_p12 = scmp.eq.s32.totalorder %s44_s22, 0  ;;  %s47_s23 = sadd.s32 1, %s494_s11 }
   0xe   : > { %p332_p10 = pneg %p559_p8  ;;  %p54_p13 = scmp.ne.s32.totalorder %s494_s11, %s490_s10 }
   0xf   : > { %s500_s24 = smov [#allocation2]   ;;  %p55_p0 = scmp.eq.s32.totalorder %s498_s12, 0 }
  0x10   : > { %p333_p11 = pnand %p332_p10, %p61_p1  ;;  %p582_p3 = por %p84_p2, %p54_p13 }
  0x11   : > { %s577_s25 = scalar_select %p45_p12, %s494_s11, %s47_s23  }
  0x12   : > { %335 = dma.hbm_to_smem (!%p333_p11), %s110_s19, 16, %s500_s24, [#allocation5]  }
  0x13   : > { %s120_s27 = sand.u32 1, %s494_s11   ;;  %p56_p5 = por %p55_p0, %p54_p13 }
  0x14   : > { %p345_p7 = scmp.lt.s32.totalorder %s498_s12, 2  ;;  %s308_s28 = sshll.u32 %s120_s27, 3 }
  0x15   : > { %s309_s29 = sshll.u32 %s498_s12, 3  ;;  %s124_s6 = scalar_lea.vmem [#allocation6], %s308_s28 }
  0x16   : > { %s128_s4 = scalar_lea.hbm %s659_s1, %s309_s29  ;;  %s132_s7 = sshll.u32 %s124_s6, 4  ;;  %s133_s7 = int_to_ptr.vmem [resolvable:$true] %s132_s7 }
  0x17   : > { %s130_s5 = sshll.u32 %s128_s4, 4  ;;  %p592_p10 = pnand %p345_p7, %p56_p5  ;;  %s131_s5 = int_to_ptr.hbm [resolvable:$true] %s130_s5 }
  0x18   : > { %s121_s14 = scalar_lea.sflag [#allocation3], %s120_s27  ;;  %s398_s17 = sshra.s32 %s131_s5, 4  ;;  %s399_s17 = int_to_ptr.hbm [resolvable:$true] %s398_s17 }
  0x19   : > { %s400_s18 = scalar_lea.hbm %s399_s17, 8  ;;  %p402_p11 = pneg %p592_p10 }
  0x1a   : > { %p401_p2 = scmp.ne.s32.totalorder %s399_s17, %s400_s18  ;;  %s405_s23 = scalar_lea.hbm %s659_s1, 16 }
  0x1b   : > { %p406_p0 = scmp.lt.s32.totalorder %s399_s17, %s659_s1  ;;  %p407_p5 = scmp.lt.s32.totalorder %s405_s23, %s400_s18 }
  0x1c   : > { %p403_p12 = pnand %p402_p11, %p401_p2 }
  0x1d   : > { %p408_p7 = por %p407_p5, %p406_p0 }
  0x1e   : > { %p404_p13 = pneg %p403_p12 }
  0x20   : > { %p409_p9 = pnand %p408_p7, %p404_p13 }
  0x22   : > { %412 = shalt.err (!%p409_p9)
}
  0x23   : > { %339 = dma.hbm_to_vmem [thread:$0]  (!%p592_p10), %s131_s5, 128, %s133_s7, %s121_s14  }
  0x24   : > { %141 = sbr.rel (%p559_p8) target bundleno = 84 (0x54), region = 28 }
  0x29   : > { %473 = dma.done.wait (%p61_p1), [#allocation5], 16  }
  0x2a   : > { %475 = vsyncadd (%p61_p1), [#allocation5], 4294967280  ;;  %s613_s27 = sand.u32 1, %s490_s10  }
  0x2b   : > { %s312_s29 = sshll.u32 %s613_s27, 3  ;;  %s149_s30 = scalar_lea.sflag [#allocation3], %s613_s27 }
  0x2c   : > { %s152_s3 = scalar_lea.vmem [#allocation6], %s312_s29 }
  0x2d   : > { %477 = dma.done.wait (%p546_p4), %s149_s30, 128  }
  0x2e   : > { %479 = vsyncadd (%p546_p4), %s149_s30, 4294967168 }
  0x2f   : > { %158 = sfence }
  0x30   : > { %s315_s20 = sld [smem:[#allocation2 + $0x2]]  ;;  %v175_v0 = vld [vmem:[%s152_s3] sm:$0xff]  ;;  %s321_s14 = sshll.u32 %s537_s13, 3 }
  0x31   : > { %s316_s4 = sld [smem:[#allocation2 + $0x3]]  ;;  %s217_s19 = scalar_lea.hbm %s660_s2, %s321_s14 }
  0x32   : > { %s318_s5 = sld [smem:[#allocation2 + $0x5]]  ;;  %s174_s22 = scalar_lea.vmem [#allocation7], %s312_s29 }
  0x33   : > { %s319_s6 = sld [smem:[#allocation2 + $0x6]]  ;;  %s219_s23 = sshll.u32 %s174_s22, 4  ;;  %s220_s23 = int_to_ptr.vmem [resolvable:$true] %s219_s23 }
  0x34   : > { %s317_s7 = sld [smem:[#allocation2 + $0x4]]  ;;  %s221_s24 = sshll.u32 %s217_s19, 4  ;;  %s222_s24 = int_to_ptr.hbm [resolvable:$true] %s221_s24 }
  0x35   : > { %s314_s8 = sld [smem:[#allocation2 + $0x1]]  ;;  %s207_s13 = scalar_lea.sflag [#allocation4], %s613_s27 }
  0x36   : > { %v185_v3 = vstv %s315_s20  ;;  %s176_s15 = sld [smem:[#allocation2]]  ;;  %s442_s28 = sshra.s32 %s222_s24, 4  ;;  %s443_s28 = int_to_ptr.hbm [resolvable:$true] %s442_s28 }
  0x37   : > { %v183_v1 = vstv %s316_s4  ;;  %s444_s30 = scalar_lea.hbm %s443_s28, 8  ;;  %s448_s4 = scalar_lea.hbm %s660_s2, 16 }
  0x38   : > { %v184_v2 = vmul.f32 %v183_v1, %v175_v0  ;;  %v195_v5 = vstv %s318_s5  ;;  %p445_p1 = scmp.ne.s32.totalorder %s443_s28, %s444_s30  ;;  %p449_p9 = scmp.lt.s32.totalorder %s443_s28, %s660_s2 }
  0x39   : > { %v193_v4 = vstv %s319_s6  ;;  %p450_p10 = scmp.lt.s32.totalorder %s448_s4, %s444_s30 }
  0x3a   : > { %v194_v6 = vmul.f32 %v193_v4, %v175_v0  ;;  %v186_v7 = vadd.f32 %v185_v3, %v184_v2  ;;  %v198_v9 = vstv %s317_s7  ;;  %p446_p4 = pnand %p445_p1, %p582_p3 }
  0x3b   : > { %v188_v12 = vstv %s314_s8  ;;  %p451_p2 = por %p450_p10, %p449_p9 }
  0x3c   : > { %v196_v8 = vadd.f32 %v195_v5, %v194_v6  ;;  %v187_v11 = vmul.f32 %v186_v7, %v175_v0  ;;  %v191_v17 = vstv %s176_s15  ;;  %p447_p8 = pneg %p446_p4 }
  0x3e   : > { %v197_v10 = vmul.f32 %v196_v8, %v175_v0  ;;  %v189_v14 = vadd.f32 %v188_v12, %v187_v11  ;;  %p452_p11 = pnand %p451_p2, %p447_p8 }
  0x40   : > { %v199_v13 = vadd.f32 %v198_v9, %v197_v10  ;;  %v190_v15 = vmul.f32 %v189_v14, %v175_v0 }
  0x42   : > { %381 = vrcp.f32 %v199_v13  ;;  %v192_v19 = vadd.f32 %v191_v17, %v190_v15 }
  0x48   : > { %v382_v16 = vpop.eup %381 }
  0x49   : > { %v201_v18 = vmul.f32 %v382_v16, %v199_v13 }
  0x4b   : > { %v202_v20 = vsub.f32 2.0, %v201_v18 }
  0x4d   : > { %v203_v21 = vmul.f32 %v382_v16, %v202_v20 }
  0x4f   : > { %v204_v22 = vmul.f32 %v203_v21, %v192_v19 }
  0x51   : > { %205 = vst [vmem:[%s174_s22] sm:$0xff] %v204_v22 }
  0x52   : > { %455 = shalt.err (!%p452_p11)
}
  0x53   : > { %330 = dma.vmem_to_hbm [thread:$0]  (%p582_p3), %s220_s23, 128, %s222_s24, %s207_s13  }
  0x54 PF: > { %s233_s27 = sand.u32 1, %s486_s9   ;;  %p666_p12 = scmp.ge.s32.totalorder %s498_s12, 2 }
  0x55   : > { %s234_s6 = scalar_lea.sflag [#allocation4], %s233_s27 }
  0x56   : > { %p341_p13 = pnand %p666_p12, %p551_p6 }
  0x58   : > { %p342_p0 = pneg %p341_p13 }
  0x5a   : > { %481 = dma.done.wait (%p342_p0), %s234_s6, 128  }
  0x5b   : > { %483 = vsyncadd (%p342_p0), %s234_s6, 4294967168  ;;  %p16_p5 = scmp.ge.s32.totalorder %s567_s21, 4   ;;  %s667_s9 = smov %s490_s10 }
  0x5c   : > { %s668_s10 = smov %s494_s11  ;;  %s669_s11 = smov %s577_s25 }
  0x5d   : > { %s670_s12 = smov %s567_s21  ;;  %18 = sbr.rel (!%p16_p5) target bundleno = 6 (0x6), region = 78 }
  0x62   :  { %240 = vsyncpa [#allocation3], 1 }
  0x63   :  { %242 = vsyncpa [#allocation3 + $0x1], 1 }
  0x64   :  { %243 = vsyncpa [#allocation4], 1 }
  0x65   :  { %245 = vsyncpa [#allocation4 + $0x1], 1 }
  0x66   :  { %246 = vsyncpa [#allocation5], 1 }
  0x67   :  { %248 = vsyncpa [#allocation5 + $0x1], 1 }

</bundles_post_ra>
